<compile_context>
chip_gen: v7x
topology: tpu7x:2x2x1
jax: 0.10.0
libtpu: 0.0.40
codegen_flags: <defaults>
</compile_context>

<pallas_src>
import functools

import jax
import jax.numpy as jnp
import numpy as np
from jax.experimental import pallas as pl
from jax.experimental.pallas import tpu as pltpu


# ----------------------------------------------------------------------------
# Interpolation matrix matching torch.nn.functional.interpolate(bilinear).
# ----------------------------------------------------------------------------
def _bilinear_matrix(out_size, in_size, align_corners=False):
    """Dense (out_size, in_size) interpolation matrix (float32)."""
    o = jnp.arange(out_size, dtype=jnp.float32)
    if align_corners and out_size > 1:
        scale = (in_size - 1) / max(out_size - 1, 1)
        src = o * scale
    else:
        scale = in_size / out_size
        src = (o + 0.5) * scale - 0.5
        src = jnp.maximum(src, 0.0)  # PyTorch clamps negative source coords
    i0 = jnp.clip(jnp.floor(src).astype(jnp.int32), 0, in_size - 1)
    i1 = jnp.minimum(i0 + 1, in_size - 1)
    w1 = src - i0.astype(jnp.float32)
    w0 = 1.0 - w1
    rows = jnp.arange(out_size)
    A = jnp.zeros((out_size, in_size), dtype=jnp.float32)
    A = A.at[rows, i0].add(w0)
    A = A.at[rows, i1].add(w1)
    return A


# ----------------------------------------------------------------------------
# Pallas kernel: separable bilinear resize of a (TILE_C, H, W) channel block.
# ----------------------------------------------------------------------------
def _resize_kernel(x_ref, aht_ref, awt_ref, o_ref):
    # x_ref   : (1, TC, H, W)      float32  VMEM
    # aht_ref : (H, Hout)          bfloat16 (row-interp matrix, transposed)
    # awt_ref : (W, Wout)          bfloat16 (col-interp matrix, transposed)
    # o_ref   : (1, TC, Hout, Wout)
    tc, h, w = x_ref.shape[1], x_ref.shape[2], x_ref.shape[3]
    hout = aht_ref.shape[1]
    wout = awt_ref.shape[1]

    x = x_ref[0]                                        # (TC, H, W) f32
    # Merge leading dims (lane dim W untouched) -> single big 2-D matmul.
    x2 = x.reshape(tc * h, w).astype(jnp.bfloat16)      # (TC*H, W)

    # ---- width pass: (TC*H, W) @ (W, Wout), f32 accumulation ----
    t = jnp.dot(x2, awt_ref[...],
                preferred_element_type=jnp.float32)     # (TC*H, Wout) f32
    t = t.reshape(tc, h, wout)                          # (TC, H, Wout)
    t = jnp.swapaxes(t, 1, 2)                           # (TC, Wout, H)  (XLU)
    t2 = t.reshape(tc * wout, h).astype(jnp.bfloat16)   # (TC*Wout, H)

    # ---- height pass: (TC*Wout, H) @ (H, Hout) ----
    o = jnp.dot(t2, aht_ref[...],
                preferred_element_type=jnp.float32)     # (TC*Wout, Hout) f32
    o = jnp.swapaxes(o.reshape(tc, wout, hout), 1, 2)   # (TC, Hout, Wout)
    o_ref[0] = o.astype(o_ref.dtype)


def _pick_tile_c(C, H, W, Hout, Wout, budget_bytes=24 * 1024 * 1024):
    """Largest divisor of C whose per-step VMEM footprint fits the budget."""
    per_c = (
        2 * H * W * 4            # double-buffered input block (f32)
        + 2 * Hout * Wout * 4    # double-buffered output block (f32)
        + H * W * 2              # bf16 copy of the input block
        + 3 * H * Wout * 4       # width-pass result + transposed/bf16 copies
        + 3 * Hout * Wout * 4    # height-pass result + final transpose
    )
    tile = int(max(1, min(C, budget_bytes // max(per_c, 1))))
    while C % tile:
        tile -= 1
    return tile


def _bilinear_resize_pallas(x, out_hw, align_corners=False):
    """x: (B, C, H, W) float32 -> (B, C, Hout, Wout) via a single Pallas call."""
    B, C, H, W = x.shape
    Hout, Wout = out_hw

    # Small interp matrices, precast to bf16 for the MXU.
    aht = _bilinear_matrix(Hout, H, align_corners).T.astype(jnp.bfloat16)  # (H, Hout)
    awt = _bilinear_matrix(Wout, W, align_corners).T.astype(jnp.bfloat16)  # (W, Wout)

    tile_c = _pick_tile_c(C, H, W, Hout, Wout)
    n_ct = C // tile_c

    return pl.pallas_call(
        _resize_kernel,
        out_shape=jax.ShapeDtypeStruct((B, C, Hout, Wout), x.dtype),
        grid=(B, n_ct),
        in_specs=[
            pl.BlockSpec((1, tile_c, H, W), lambda b, c: (b, c, 0, 0)),
            pl.BlockSpec((H, Hout), lambda b, c: (0, 0)),
            pl.BlockSpec((W, Wout), lambda b, c: (0, 0)),
        ],
        out_specs=pl.BlockSpec((1, tile_c, Hout, Wout), lambda b, c: (b, c, 0, 0)),
        compiler_params=pltpu.CompilerParams(
            dimension_semantics=("parallel", "parallel"),
            vmem_limit_bytes=48 * 1024 * 1024,
        ),
    )(x, aht, awt)


# ----------------------------------------------------------------------------
# forward_feature (JAX/Pallas equivalent of the PyTorch module)
# ----------------------------------------------------------------------------
def forward_feature(inputs,
                    input_transform='resize_concat',
                    in_index=(0, 1, 2, 3),
                    upsample=4,
                    align_corners=False):
    # _forward_feature: fold cls tokens into the channel dim.
    processed = []
    for x in inputs:
        if isinstance(x, (tuple, list)) and len(x) == 2:
            feat, cls_token = x
            if feat.ndim == 2:
                feat = feat[:, :, None, None]
            cls_b = jnp.broadcast_to(cls_token[:, :, None, None], feat.shape)
            processed.append(jnp.concatenate([feat, cls_b], axis=1))
        else:
            if x.ndim == 2:
                x = x[:, :, None, None]
            processed.append(x)

    # _transform_inputs with 'resize_concat': select, then bilinear-resize each
    # selected feature to upsample * spatial size of the first selected one.
    # (The reference module returns the list; it does NOT concatenate.)
    if 'concat' in input_transform:
        selected = [processed[i] for i in in_index]
        if 'resize' in input_transform:
            H0, W0 = selected[0].shape[2], selected[0].shape[3]
            out_hw = (H0 * upsample, W0 * upsample)
            shapes = {tuple(s.shape) for s in selected}
            if len(shapes) == 1 and len(selected) > 1:
                # Fuse all levels into ONE pallas_call (stack along batch).
                L = len(selected)
                B = selected[0].shape[0]
                stacked = jnp.concatenate(selected, axis=0)        # (L*B, C, H, W)
                resized = _bilinear_resize_pallas(stacked, out_hw, align_corners)
                selected = [resized[i * B:(i + 1) * B] for i in range(L)]
            else:
                selected = [
                    _bilinear_resize_pallas(s, out_hw, align_corners)
                    for s in selected
                ]
        return selected
    elif input_transform == 'multiple_select':
        return [processed[i] for i in in_index]
    else:
        return processed[in_index]


# ----------------------------------------------------------------------------
# Pure-jnp reference (for a loose plumbing/correctness check).
# ----------------------------------------------------------------------------
def _reference_resize(x, out_hw, align_corners=False):
    B, C, H, W = x.shape
    Hout, Wout = out_hw
    ah = _bilinear_matrix(Hout, H, align_corners)   # (Hout, H)
    aw = _bilinear_matrix(Wout, W, align_corners)   # (Wout, W)
    return jnp.einsum('oh,pw,bchw->bcop', ah, aw, x)


if __name__ == "__main__":
    key = jax.random.PRNGKey(0)
    B, C, H, W = 2, 4, 8, 8          # small synthetic multi-level features
    num_levels = 4
    upsample = 4

    keys = jax.random.split(key, 2 * num_levels)
    inputs = []
    for i in range(num_levels):
        feat = jax.random.normal(keys[2 * i], (B, C, H, W), dtype=jnp.float32)
        cls_tok = jax.random.normal(keys[2 * i + 1], (B, C), dtype=jnp.float32)
        inputs.append((feat, cls_tok))   # mimics (patch_tokens, cls_token) tuples

    outs = forward_feature(inputs, input_transform='resize_concat',
                           in_index=(0, 1, 2, 3), upsample=upsample,
                           align_corners=False)

    for o in outs:
        jax.block_until_ready(o)

    expected = (B, 2 * C, H * upsample, W * upsample)
    assert len(outs) == num_levels
    assert all(o.shape == expected for o in outs), [o.shape for o in outs]
    assert all(o.dtype == jnp.float32 for o in outs)

    # Loose numerical sanity check vs. a pure-f32 reference (kernel uses bf16
    # operands on the MXU with f32 accumulation, so a loose tolerance is used;
    # this catches layout/transpose/tiling bugs, not ulp-level differences).
    out_hw = (H * upsample, W * upsample)
    for lvl in range(num_levels):
        feat, cls_tok = inputs[lvl]
        proc = jnp.concatenate(
            [feat, jnp.broadcast_to(cls_tok[:, :, None, None], feat.shape)], axis=1)
        ref = _reference_resize(proc, out_hw, align_corners=False)
        np.testing.assert_allclose(np.asarray(outs[lvl]), np.asarray(ref),
                                   atol=0.2, rtol=0.05)

    print("KERNEL_OK")
</pallas_src>

<mosaic_0001>
module attributes {stable_mosaic.version = 11 : i64} {
  func.func @_resize_kernel(%arg0: i32, %arg1: i32, %arg2: memref<1x8x8x8xf32, #tpu.memory_space<vmem>>, %arg3: memref<8x32xbf16, #tpu.memory_space<vmem>>, %arg4: memref<8x32xbf16, #tpu.memory_space<vmem>>, %arg5: memref<1x8x32x32xf32, #tpu.memory_space<vmem>>) attributes {dimension_semantics = [#tpu.dimension_semantics<parallel>, #tpu.dimension_semantics<parallel>], iteration_bounds = array<i64: 8, 1>, scalar_prefetch = 0 : i64, scratch_operands = 0 : i64, tpu.core_type = #tpu.core_type<tc>, window_params = [{transform_indices = @transform_0, window_bounds = array<i64: 1, 8, 8, 8>}, {pipeline_mode = #tpu.pipeline_mode<synchronous>, transform_indices = @transform_1, window_bounds = array<i64: 8, 32>}, {pipeline_mode = #tpu.pipeline_mode<synchronous>, transform_indices = @transform_2, window_bounds = array<i64: 8, 32>}, {transform_indices = @transform_3, window_bounds = array<i64: 1, 8, 32, 32>}]} {
    %c0 = arith.constant 0 : index
    %c0_0 = arith.constant 0 : index
    %c0_1 = arith.constant 0 : index
    %c0_2 = arith.constant 0 : index
    %0 = vector.load %arg2[%c0, %c0_0, %c0_1, %c0_2] : memref<1x8x8x8xf32, #tpu.memory_space<vmem>>, vector<1x8x8x8xf32>
    %1 = vector.shape_cast %0 : vector<1x8x8x8xf32> to vector<8x8x8xf32>
    %2 = vector.shape_cast %1 : vector<8x8x8xf32> to vector<64x8xf32>
    %3 = arith.truncf %2 : vector<64x8xf32> to vector<64x8xbf16>
    %c0_3 = arith.constant 0 : index
    %c0_4 = arith.constant 0 : index
    %4 = vector.load %arg4[%c0_3, %c0_4] : memref<8x32xbf16, #tpu.memory_space<vmem>>, vector<8x32xbf16>
    %cst = arith.constant dense<0.000000e+00> : vector<64x32xf32>
    %5 = tpu.matmul %3, %4, %cst {dimension_numbers = #tpu.dot_dimension_numbers<[1], [0], [0], [1], [0, 0, 1, 1], [], []>} : vector<64x8xbf16>, vector<8x32xbf16>, vector<64x32xf32> -> vector<64x32xf32>
    %6 = vector.shape_cast %5 : vector<64x32xf32> to vector<8x8x32xf32>
    %7 = tpu.transpose %6, [0, 2, 1] : vector<8x8x32xf32> -> vector<8x32x8xf32>
    %8 = vector.shape_cast %7 : vector<8x32x8xf32> to vector<256x8xf32>
    %9 = arith.truncf %8 : vector<256x8xf32> to vector<256x8xbf16>
    %c0_5 = arith.constant 0 : index
    %c0_6 = arith.constant 0 : index
    %10 = vector.load %arg3[%c0_5, %c0_6] : memref<8x32xbf16, #tpu.memory_space<vmem>>, vector<8x32xbf16>
    %cst_7 = arith.constant dense<0.000000e+00> : vector<256x32xf32>
    %11 = tpu.matmul %9, %10, %cst_7 {dimension_numbers = #tpu.dot_dimension_numbers<[1], [0], [0], [1], [0, 0, 1, 1], [], []>} : vector<256x8xbf16>, vector<8x32xbf16>, vector<256x32xf32> -> vector<256x32xf32>
    %12 = vector.shape_cast %11 : vector<256x32xf32> to vector<8x32x32xf32>
    %13 = tpu.transpose %12, [0, 2, 1] : vector<8x32x32xf32> -> vector<8x32x32xf32>
    %c0_8 = arith.constant 0 : index
    %c0_9 = arith.constant 0 : index
    %c0_10 = arith.constant 0 : index
    %c0_11 = arith.constant 0 : index
    %14 = vector.load %arg5[%c0_8, %c0_9, %c0_10, %c0_11] : memref<1x8x32x32xf32, #tpu.memory_space<vmem>>, vector<1x8x32x32xf32>
    %15 = vector.shape_cast %14 : vector<1x8x32x32xf32> to vector<8x32x32xf32>
    %16 = vector.shape_cast %13 : vector<8x32x32xf32> to vector<1x8x32x32xf32>
    tpu.vector_store %arg5[%c0_8, %c0_9, %c0_10, %c0_11], %16 {strides = array<i32>} : memref<1x8x32x32xf32, #tpu.memory_space<vmem>>, vector<1x8x32x32xf32>,
    return
  }
  func.func @transform_0(%arg0: i32, %arg1: i32) -> (i32, i32, i32, i32) {
    %c0_i32 = arith.constant 0 : i32
    %c0_i32_0 = arith.constant 0 : i32
    %c0_i32_1 = arith.constant 0 : i32
    return %arg0, %arg1, %c0_i32, %c0_i32_0 : i32, i32, i32, i32
  }
  func.func @transform_1(%arg0: i32, %arg1: i32) -> (i32, i32) {
    %c0_i32 = arith.constant 0 : i32
    %c0_i32_0 = arith.constant 0 : i32
    %c0_i32_1 = arith.constant 0 : i32
    return %c0_i32, %c0_i32_0 : i32, i32
  }
  func.func @transform_2(%arg0: i32, %arg1: i32) -> (i32, i32) {
    %c0_i32 = arith.constant 0 : i32
    %c0_i32_0 = arith.constant 0 : i32
    %c0_i32_1 = arith.constant 0 : i32
    return %c0_i32, %c0_i32_0 : i32, i32
  }
  func.func @transform_3(%arg0: i32, %arg1: i32) -> (i32, i32, i32, i32) {
    %c0_i32 = arith.constant 0 : i32
    %c0_i32_0 = arith.constant 0 : i32
    %c0_i32_1 = arith.constant 0 : i32
    return %arg0, %arg1, %c0_i32, %c0_i32_0 : i32, i32, i32, i32
  }
}

</mosaic_0001>

<bundles_post_ra>
// kernel: tpu_custom_call.1
= control target key start
LH: loop header
LB: loop body
LE: loop exit
PB: predicated region body
PF: predicated region fallthrough
CT: control target
= control target key end

     0   :  { %8 = vsyncpa [#allocation3], 0  ;;  %s1970_s0 = inlined_call_operand.hbm [shape: f32[8,8,8,8], index: 0, kind: input, shape index: {}]   ;;  %s1971_s1 = inlined_call_operand.hbm [shape: bf16[8,32], index: 1, kind: input, shape index: {}]   ;;  %s1972_s2 = inlined_call_operand.vmem [shape: bf16[8,32], index: 2, kind: input, shape index: {}]   ;;  %s1973_s3 = inlined_call_operand.hbm [shape: f32[8,8,32,32], index: 3, kind: output, shape index: {}]  }
   0x1   :  { %10 = vsyncpa [#allocation3 + $0x1], 0 }
   0x2   :  { %11 = vsyncpa [#allocation6], 0 }
   0x3   :  { %12 = vsyncpa [#allocation4], 0 }
   0x4   :  { %14 = vsyncpa [#allocation4 + $0x1], 0  ;;  %s1655_s12 = smov 0   ;;  %s1657_s13 = smov 0  }
   0x5   :  { %s1659_s14 = smov 0   ;;  %s1661_s15 = smov 0  }
   0x6   :  { %s1663_s16 = smov 0   ;;  %s1665_s17 = smov 0  }
   0x7 LB: > { %s1206_s18 = sadd.s32 4294967295, %s1626_s17   ;;  %s1207_s19 = sadd.s32 4294967294, %s1626_s17   ;;  %s1626_s17 = sphi %s1665_s17, %s20_s17   ;;  %s1622_s16 = sphi %s1663_s16, %s2000_s16   ;;  %s1618_s15 = sphi %s1661_s15, %s1999_s15   ;;  %s1614_s14 = sphi %s1659_s14, %s1998_s14   ;;  %s1610_s13 = sphi %s1657_s13, %s1997_s13   ;;  %s1606_s12 = sphi %s1655_s12, %s1996_s12  }
   0x8   : > { %s41_s20 = sadd.s32 1, %s1614_s14  ;;  %p48_p0 = scmp.ne.s32.totalorder %s1614_s14, %s1610_s13 }
   0x9   : > { %p49_p1 = scmp.eq.s32.totalorder %s1626_s17, 0  ;;  %p54_p2 = scmp.ne.s32.totalorder %s1610_s13, %s1606_s12 }
   0xa   : > { %p1693_p3 = scmp.eq.s32.totalorder %s1206_s18, 0  ;;  %p122_p4 = scmp.eq.s32.totalorder %s1206_s18, 7 }
   0xb   : > { %p1697_p5 = por %p49_p1, %p48_p0  ;;  %p128_p6 = scmp.eq.s32.totalorder %s1207_s19, 7 }
   0xc   : > { %s1980_s21 = scalar_select %p1693_p3, 1, 0 }
   0xd   : > { %p1703_p7 = por %p1693_p3, %p54_p2  ;;  %p1707_p8 = por %p122_p4, %p48_p0 }
   0xe   : > { %p1711_p9 = por %p128_p6, %p54_p2  ;;  %p1208_p10 = scmp.ge.s32.totalorder %s1626_s17, 1 }
   0xf   : > { %s1982_s23 = scalar_select %p1703_p7, 1, 0 }
  0x10   : > { %s1983_s24 = scalar_select %p1707_p8, 1, 0 }
  0x11   : > { %s1984_s25 = scalar_select %p1711_p9, 1, 0 }
  0x12   : > { %p135_p11 = scmp.lt.s32.totalorder %s1626_s17, 9  ;;  %s1628_s27 = smov [#allocation5]  }
  0x13   : > { %s148_s28 = sshll.u32 %s1628_s27, 4  ;;  %p1337_p13 = scmp.lt.s32.totalorder %s1626_s17, 8  ;;  %s149_s28 = int_to_ptr.vmem [resolvable:$true] %s148_s28 }
  0x14   : > { %p1717_p12 = pnand %p1208_p10, %p135_p11  ;;  %s32_s4 = sadd.s32 1, %s1622_s16 }
  0x15   : > { %p1726_p1 = pnand %p1337_p13, %p1697_p5  ;;  %p1737_p4 = scmp.ge.s32.totalorder %s32_s4, 8 }
  0x16   : > { %s1985_s26 = scalar_select %p1717_p12, 1, 0 }
  0x17   : > { %p1324_p0 = pneg %p1717_p12  ;;  %s162_s6 = sand.u32 1, %s1614_s14  }
  0x18   : > { %s1986_s29 = scalar_select %p1726_p1, 1, 0 }
  0x19   : > { %p1732_p2 = pnand %p1324_p0, %p1693_p3  ;;  %s1482_s9 = scalar_lea.hbm %s1971_s1, 64 }
  0x1a   : > { %s1988_s5 = scalar_select %p1737_p4, 1, 0 }
  0x1b   : > { %p1483_p5 = scmp.ne.s32.totalorder %s1971_s1, %s1482_s9  ;;  %p1484_p6 = pneg %p1732_p2 }
  0x1c   : > { %p1489_p13 = scmp.lt.u32.totalorder %s1482_s9, %s1971_s1 }
  0x1d   : > { %p1485_p10 = pnand %p1484_p6, %p1483_p5 }
  0x1f   : > { %p1486_p11 = pneg %p1485_p10 }
  0x21   : > { %p1491_p0 = pnand %p1489_p13, %p1486_p11 }
  0x23   : > { %1494 = shalt.err (!%p1491_p0)
}
  0x24   : > { %s1495_s22 = scalar_lea.vmem %s149_s28, 64  ;;  %p1503_p7 = scmp.lt.s32.totalorder %s149_s28, %s149_s28 }
  0x25   : > { %p1496_p9 = scmp.ne.s32.totalorder %s149_s28, %s1495_s22  ;;  %p1504_p12 = scmp.lt.s32.totalorder %s1495_s22, %s1495_s22 }
  0x27   : > { %p1498_p8 = pnand %p1496_p9, %p1484_p6  ;;  %p1505_p1 = por %p1504_p12, %p1503_p7 }
  0x29   : > { %p1499_p3 = pneg %p1498_p8 }
  0x2b   : > { %p1506_p4 = pnand %p1505_p1, %p1499_p3 }
  0x2d   : > { %1509 = shalt.err (!%p1506_p4)
}
  0x2e   : > { %1327 = dma.hbm_to_vmem [thread:$0]  (!%p1732_p2), %s1971_s1, 64, %s149_s28, [#allocation6]  }
  0x2f   : > { %p1989_p9 = scmp.ne.s32.totalorder %s1988_s5, 0  ;;  %s1211_s8 = sshll.u32 %s162_s6, 6 }
  0x30   : > { %s1243_s10 = sshll.u32 %s1622_s16, 10  ;;  %s166_s19 = scalar_lea.vmem [#allocation2], %s1211_s8 }
  0x31   : > { %s2002_s4 = smov (%p1989_p9, %s32_s4), 0  ;;  %s1768_s18 = scalar_lea.hbm %s1970_s0, %s1243_s10 }
  0x32   : > { %s36_s9 = ssub.s32 %s1622_s16, %s2002_s4  ;;  %s175_s22 = sshll.u32 %s166_s19, 4  ;;  %s1775_s22 = int_to_ptr.vmem [resolvable:$true] %s175_s22 }
  0x33   : > { %p39_p3 = scmp.eq.s32.totalorder %s36_s9, 0  ;;  %s1777_s5 = scalar_lea.sflag [#allocation3], %s162_s6 }
  0x34   : > { %s1510_s27 = scalar_lea.hbm %s1768_s18, 1024  ;;  %p1990_p8 = scmp.ne.s32.totalorder %s1986_s29, 0 }
  0x35   : > { %s1773_s28 = scalar_select %p39_p3, %s1614_s14, %s41_s20  }
  0x36   : > { %p1511_p7 = scmp.ne.s32.totalorder %s1768_s18, %s1510_s27  ;;  %p1512_p12 = pneg %p1990_p8 }
  0x37   : > { %s1515_s8 = scalar_lea.hbm %s1970_s0, 8192  ;;  %p1516_p4 = scmp.lt.u32.totalorder %s1768_s18, %s1970_s0 }
  0x38   : > { %p1513_p1 = pnand %p1512_p12, %p1511_p7  ;;  %p1517_p5 = scmp.lt.u32.totalorder %s1515_s8, %s1510_s27 }
  0x39   : > { %p1519_p10 = scmp.lt.u32.totalorder %s1510_s27, %s1768_s18 }
  0x3a   : > { %p1514_p2 = pneg %p1513_p1  ;;  %p1518_p6 = por %p1517_p5, %p1516_p4 }
  0x3c   : > { %p1520_p11 = por %p1519_p10, %p1518_p6 }
  0x3e   : > { %p1521_p13 = pnand %p1520_p11, %p1514_p2 }
  0x40   : > { %1524 = shalt.err (!%p1521_p13)
}
  0x41   : > { %s1525_s20 = scalar_lea.vmem %s1775_s22, 1024  ;;  %s1629_s6 = smov [#allocation2]  }
  0x42   : > { %p1526_p0 = scmp.ne.s32.totalorder %s1775_s22, %s1525_s20  ;;  %s1530_s11 = sshll.u32 %s1629_s6, 4  ;;  %s1531_s11 = int_to_ptr.vmem [resolvable:$false] %s1530_s11 }
  0x43   : > { %s1532_s19 = scalar_lea.vmem %s1531_s11, 2048  ;;  %p1533_p7 = scmp.lt.s32.totalorder %s1775_s22, %s1531_s11 }
  0x44   : > { %p1528_p9 = pnand %p1526_p0, %p1512_p12  ;;  %p1534_p1 = scmp.lt.s32.totalorder %s1532_s19, %s1525_s20 }
  0x46   : > { %p1529_p3 = pneg %p1528_p9  ;;  %p1535_p4 = por %p1534_p1, %p1533_p7 }
  0x48   : > { %p1536_p5 = pnand %p1535_p4, %p1529_p3 }
  0x4a   : > { %1539 = shalt.err (!%p1536_p5)
}
  0x4b   : > { %s1630_s27 = smov 128   ;;  %s1631_s7 = smov 8  }
  0x4c   : > { %1331 = dma.hbm_to_vmem [thread:$0]  (!%p1990_p8), %s1768_s18, 1024, %s1775_s22, %s1777_s5, %s1630_s27, %s1630_s27, %s1631_s7  }
  0x4d   : > { %p1991_p12 = scmp.ne.s32.totalorder %s1985_s26, 0 }
  0x4e   : > { %s1808_s9 = sand.u32 (!%p1991_p12), 1, %s1610_s13   ;;  %p1992_p2 = scmp.ne.s32.totalorder (!%p1991_p12), %s1982_s23, 0 }
  0x4f   : > { %187 = sbr.rel (%p1991_p12) target bundleno = 896 (0x380), region = 32  ;;  %s1215_s8 = sshll.u32 (!%p1991_p12), %s1808_s9, 6 }
  0x50   : > { %s190_s10 = scalar_lea.sflag (!%p1991_p12), [#allocation3], %s1808_s9  ;;  %s193_s30 = scalar_lea.vmem (!%p1991_p12), [#allocation2], %s1215_s8 }
  0x56   : > { %1593 = dma.done.wait (%p1992_p2), %s190_s10, 1024  }
  0x57   : > { %1595 = vsyncadd (%p1992_p2), %s190_s10, 4294966272  ;;  %p1993_p6 = scmp.ne.s32.totalorder %s1980_s21, 0 }
  0x59   : > { %1597 = dma.done.wait (%p1993_p6), [#allocation6], 64  }
  0x5a   : > { %1599 = vsyncadd (%p1993_p6), [#allocation6], 4294967232  ;;  %vm249_vm0 = vcmask 1043456   ;;  %v235_v0 = vld [vmem:[%s1972_s2] sm:$0xf]  ;;  %v224_v2 = vld [vmem:[%s193_s30 + $0x8] sm:$0xff] }
  0x5b   : > { %v223_v1 = vld [vmem:[%s193_s30] sm:$0xff]  ;;  %vm236_vm1 = vcmask 64512   ;;  %1313 = vmatprep.subr.msk.bf16.mxu0 %vm249_vm0, %v235_v0  ;;  %v251_v3 = vsel %vm249_vm0, %v235_v0, 0  ;;  %v225_v5 = vld [vmem:[%s193_s30 + $0x10] sm:$0xff]  ;;  %v226_v6 = vld [vmem:[%s193_s30 + $0x18] sm:$0xff]  ;;  %s1217_s21 = sshll.u32 %s1808_s9, 8 }
  0x5c   : > { %v231_v4 = vpack.c.bf16 %v224_v2, %v223_v1  ;;  %v227_v7 = vld [vmem:[%s193_s30 + $0x20] sm:$0xff]  ;;  %1268 = vmatpush3.bf16.msra.mxu0 %v251_v3  ;;  %v232_v8 = vpack.c.bf16 %v226_v6, %v225_v5  ;;  %v228_v9 = vld [vmem:[%s193_s30 + $0x28] sm:$0xff]  ;;  %v229_v11 = vld [vmem:[%s193_s30 + $0x30] sm:$0xff]  ;;  %vm1059_vm2 = vcmask 261120   ;;  %s1849_s23 = scalar_lea.vmem [#allocation7], %s1217_s21  ;;  %s1244_s18 = sshll.u32 %s1618_s15, 12 }
  0x5d   : > { %v233_v10 = vpack.c.bf16 %v228_v9, %v227_v7  ;;  %v230_v12 = vld [vmem:[%s193_s30 + $0x38] sm:$0xff]  ;;  %v590_v26 = vld [vmem:[#allocation5] sm:$0xf]  ;;  %s1109_s22 = sshll.u32 %s1849_s23, 4  ;;  %s1918_s6 = scalar_lea.hbm %s1973_s3, %s1244_s18  ;;  %s1920_s22 = int_to_ptr.vmem [resolvable:$true] %s1109_s22 }
  0x5e   : > { %1269 = vmatprep.mubr.msk.bf16.mxu0 %vm236_vm1, %v231_v4  ;;  %v234_v13 = vpack.c.bf16 %v230_v12, %v229_v11  ;;  %1315 = vmatprep.subr.msk.bf16.mxu1 %vm249_vm0, %v590_v26  ;;  %v640_v27 = vsel %vm249_vm0, %v590_v26, 0  ;;  %s1093_s11 = scalar_lea.sflag [#allocation4], %s1808_s9  ;;  %s1540_s19 = scalar_lea.vmem %s1920_s22, 4096 }
  0x5f   : > { %1270 = vmatmul.mubr.msk.bf16.vlgmr.msra.gmra.mrb[0].mxu0 %vm236_vm1, %v232_v8  ;;  %1312 = vmatpush3.bf16.msra.mxu1 %v640_v27  ;;  %p1541_p8 = scmp.ne.s32.totalorder %s1920_s22, %s1540_s19  ;;  %p1994_p10 = scmp.ne.s32.totalorder %s1983_s24, 0 }
  0x60   : > { %1273 = vmatprep.mubr.msk.bf16.mxu0 %vm236_vm1, %v233_v10  ;;  %1314 = vmatprep.subr.msk.bf16.mxu0 %vm249_vm0, %v590_v26  ;;  %s1632_s15 = smov [#allocation7]  }
  0x61   : > { %1278 = vmatpush3.bf16.msra.mxu0 %v640_v27  ;;  %p1542_p11 = pnand %p1541_p8, %p1994_p10  ;;  %s1544_s27 = sshll.u32 %s1632_s15, 4  ;;  %s1545_s27 = int_to_ptr.vmem [resolvable:$false] %s1544_s27 }
  0x62   : > { %s1546_s7 = scalar_lea.vmem %s1545_s27, 8192  ;;  %p1547_p0 = scmp.lt.s32.totalorder %s1920_s22, %s1545_s27 }
  0x63   : > { %p1543_p13 = pneg %p1542_p11  ;;  %p1548_p9 = scmp.lt.s32.totalorder %s1546_s7, %s1540_s19 }
  0x65   : > { %p1549_p3 = por %p1548_p9, %p1547_p0 }
  0x67   : > { %1274 = vmatmul.mubr.msk.bf16.gmra.mrb[4].mxu0 %vm236_vm1, %v234_v13  ;;  %p1550_p7 = pnand %p1549_p3, %p1543_p13 }
 0x132   : > { %v1271_v14 = vpop.f32.mrb[0].mxu0 }
 0x133   : > { %v287_v15 = vpop.f32.mrb[1].mxu0 }
 0x134   : > { %v1272_v16 = vpop.f32.mrb[2].mxu0 }
 0x135   : > { %v290_v17 = vpop.f32.mrb[3].mxu0 }
 0x13a   : > { %v1275_v18 = vpop.f32.mrb[4].mxu0 }
 0x13b   : > { %v303_v19 = vpop.f32.mrb[5].mxu0  ;;  %v1438_v20 = vpack.i.bf16 %v1275_v18, %v290_v17 }
 0x13c   : > { %v1276_v21 = vpop.f32.mrb[6].mxu0  ;;  %v1394_v22 = vpack.i.bf16 %v303_v19, %v1272_v16 }
 0x13d   : > { %v1460_v23 = vpack.i.bf16 %v1276_v21, %v1271_v14  ;;  %1439 = vxpose.xlu1.b32.start.end [1/1] (short) (narrow) %v1438_v20, 32  ;;  %v306_v24 = vpop.f32.mrb[7].mxu0 }
 0x13e   : > { %v1416_v25 = vpack.i.bf16 %v306_v24, %v287_v15  ;;  %1395 = vxpose.xlu0.b32.start.end [1/1] (short) (narrow) %v1394_v22, 32 }
 0x14a   : > { %1461 = vxpose.xlu1.b32.start.end [1/1] (short) (narrow) %v1460_v23, 32 }
 0x14b   : > { %1417 = vxpose.xlu0.b32.start.end [1/1] (short) (narrow) %v1416_v25, 32 }
 0x1bd   : > { %v1440_v28 = vpop.trf.xlu1 }
 0x1be   : > { %v1396_v29 = vpop.trf.xlu0  ;;  %v1444_v60 = vunpack.i.h.bf16 %v1440_v28  ;;  %v1441_v61 = vunpack.i.l.bf16 %v1440_v28 }
 0x1bf   : > { %v1397_v33 = vunpack.i.l.bf16 %v1396_v29  ;;  %v1400_v42 = vunpack.i.h.bf16 %v1396_v29 }
 0x1c1   : > { %v1445_v30 = vpop.trf.xlu1 }
 0x1c2   : > { %v1401_v31 = vpop.trf.xlu0  ;;  %v1449_v62 = vunpack.i.h.bf16 %v1445_v30  ;;  %v1446_v63 = vunpack.i.l.bf16 %v1445_v30 }
 0x1c3   : > { %v1402_v32 = vunpack.i.l.bf16 %v1401_v31  ;;  %v1405_v38 = vunpack.i.h.bf16 %v1401_v31 }
 0x1c4   : > { %v576_v6 = vpack.c.bf16 %v1446_v63, %v1441_v61  ;;  %v586_v7 = vpack.c.bf16 %v1449_v62, %v1444_v60 }
 0x1c5   : > { %v580_v34 = vpack.c.bf16 %v1402_v32, %v1397_v33  ;;  %v1450_v35 = vpop.trf.xlu1  ;;  %v582_v46 = vpack.c.bf16 %v1405_v38, %v1400_v42 }
 0x1c6   : > { %v1406_v36 = vpop.trf.xlu0  ;;  %v1454_v10 = vunpack.i.h.bf16 %v1450_v35  ;;  %v1451_v11 = vunpack.i.l.bf16 %v1450_v35 }
 0x1c7   : > { %1291 = vmatprep.mubr.msk.bf16.mxu1 %vm236_vm1, %v580_v34  ;;  %v1407_v40 = vunpack.i.l.bf16 %v1406_v36  ;;  %v1410_v47 = vunpack.i.h.bf16 %v1406_v36 }
 0x1c9   : > { %v1455_v37 = vpop.trf.xlu1 }
 0x1ca   : > { %v1411_v39 = vpop.trf.xlu0  ;;  %v1459_v12 = vunpack.i.h.bf16 %v1455_v37  ;;  %v1456_v13 = vunpack.i.l.bf16 %v1455_v37 }
 0x1cb   : > { %v1412_v41 = vunpack.i.l.bf16 %v1411_v39  ;;  %v1415_v48 = vunpack.i.h.bf16 %v1411_v39 }
 0x1cc   : > { %v577_v18 = vpack.c.bf16 %v1456_v13, %v1451_v11  ;;  %v587_v19 = vpack.c.bf16 %v1459_v12, %v1454_v10 }
 0x1cd   : > { %v581_v43 = vpack.c.bf16 %v1412_v41, %v1407_v40  ;;  %v1462_v44 = vpop.trf.xlu1  ;;  %v583_v56 = vpack.c.bf16 %v1415_v48, %v1410_v47 }
 0x1ce   : > { %v1418_v45 = vpop.trf.xlu0  ;;  %v1466_v14 = vunpack.i.h.bf16 %v1462_v44  ;;  %v1463_v15 = vunpack.i.l.bf16 %v1462_v44 }
 0x1cf   : > { %1292 = vmatmul.mubr.msk.bf16.vlgmr.msra.gmra.mrb[0].mxu1 %vm236_vm1, %v581_v43  ;;  %v1422_v50 = vunpack.i.h.bf16 %v1418_v45  ;;  %v1419_v51 = vunpack.i.l.bf16 %v1418_v45 }
 0x1d0   : > { %1295 = vmatprep.mubr.msk.bf16.mxu1 %vm236_vm1, %v582_v46 }
 0x1d1   : > { %v1467_v49 = vpop.trf.xlu1 }
 0x1d2   : > { %v1423_v52 = vpop.trf.xlu0  ;;  %v1471_v16 = vunpack.i.h.bf16 %v1467_v49  ;;  %v1468_v17 = vunpack.i.l.bf16 %v1467_v49 }
 0x1d3   : > { %v1427_v53 = vunpack.i.h.bf16 %v1423_v52  ;;  %v1424_v54 = vunpack.i.l.bf16 %v1423_v52 }
 0x1d4   : > { %v578_v20 = vpack.c.bf16 %v1468_v17, %v1463_v15  ;;  %v588_v21 = vpack.c.bf16 %v1471_v16, %v1466_v14 }
 0x1d5   : > { %v574_v55 = vpack.c.bf16 %v1424_v54, %v1419_v51  ;;  %v584_v57 = vpack.c.bf16 %v1427_v53, %v1422_v50  ;;  %v1472_v58 = vpop.trf.xlu1 }
 0x1d6   : > { %v1428_v59 = vpop.trf.xlu0  ;;  %v1476_v22 = vunpack.i.h.bf16 %v1472_v58  ;;  %v1473_v23 = vunpack.i.l.bf16 %v1472_v58 }
 0x1d7   : > { %1279 = vmatprep.mubr.msk.bf16.mxu0 %vm236_vm1, %v574_v55  ;;  %1296 = vmatmul.mubr.msk.bf16.gmra.mrb[4].mxu1 %vm236_vm1, %v583_v56  ;;  %v1432_v1 = vunpack.i.h.bf16 %v1428_v59  ;;  %v1429_v2 = vunpack.i.l.bf16 %v1428_v59 }
 0x1d8   : > { %1299 = vmatprep.mubr.msk.bf16.mxu1 %vm236_vm1, %v584_v57 }
 0x1d9   : > { %v1477_v0 = vpop.trf.xlu1 }
 0x1da   : > { %v1433_v3 = vpop.trf.xlu0  ;;  %v1481_v24 = vunpack.i.h.bf16 %v1477_v0  ;;  %v1478_v25 = vunpack.i.l.bf16 %v1477_v0 }
 0x1db   : > { %v1437_v4 = vunpack.i.h.bf16 %v1433_v3  ;;  %v1434_v5 = vunpack.i.l.bf16 %v1433_v3 }
 0x1dc   : > { %v579_v26 = vpack.c.bf16 %v1478_v25, %v1473_v23  ;;  %v589_v27 = vpack.c.bf16 %v1481_v24, %v1476_v22 }
 0x1dd   : > { %v575_v8 = vpack.c.bf16 %v1434_v5, %v1429_v2  ;;  %v585_v9 = vpack.c.bf16 %v1437_v4, %v1432_v1 }
 0x1df   : > { %1280 = vmatmul.mubr.msk.bf16.vlgmr.msra.gmra.mrb[8].mxu0 %vm236_vm1, %v575_v8  ;;  %1300 = vmatmul.mubr.msk.bf16.gmra.mrb[8].mxu1 %vm236_vm1, %v585_v9 }
 0x1e0   : > { %1283 = vmatprep.mubr.msk.bf16.mxu0 %vm236_vm1, %v576_v6  ;;  %1303 = vmatprep.mubr.msk.bf16.mxu1 %vm236_vm1, %v586_v7 }
 0x1e7   : > { %1284 = vmatmul.mubr.msk.bf16.gmra.mrb[12].mxu0 %vm236_vm1, %v577_v18  ;;  %1304 = vmatmul.mubr.msk.bf16.gmra.mrb[12].mxu1 %vm236_vm1, %v587_v19 }
 0x1e8   : > { %1287 = vmatprep.mubr.msk.bf16.mxu0 %vm236_vm1, %v578_v20  ;;  %1307 = vmatprep.mubr.msk.bf16.mxu1 %vm236_vm1, %v588_v21 }
 0x1ef   : > { %1288 = vmatmul.mubr.msk.bf16.gmra.mrb[16].mxu0 %vm236_vm1, %v579_v26  ;;  %1308 = vmatmul.mubr.msk.bf16.gmra.mrb[16].mxu1 %vm236_vm1, %v589_v27 }
 0x2a2   : > { %v1293_v28 = vpop.f32.mrb[0].mxu1 }
 0x2a3   : > { %v724_v29 = vpop.f32.mrb[1].mxu1 }
 0x2a4   : > { %v1294_v30 = vpop.f32.mrb[2].mxu1  ;;  %899 = vxpose.xlu1.b32.start [1/4] (short) (narrow) %v724_v29, 32 }
 0x2a5   : > { %v727_v31 = vpop.f32.mrb[3].mxu1 }
 0x2a8   : > { %900 = vxpose.xlu1.b32.cont [2/4] (short) (narrow) %v727_v31, 32 }
 0x2aa   : > { %v1297_v32 = vpop.f32.mrb[4].mxu1 }
 0x2ab   : > { %v740_v33 = vpop.f32.mrb[5].mxu1 }
 0x2ac   : > { %v1298_v34 = vpop.f32.mrb[6].mxu1  ;;  %901 = vxpose.xlu1.b32.cont [3/4] (short) (narrow) %v1293_v28, 32 }
 0x2ad   : > { %v743_v35 = vpop.f32.mrb[7].mxu1 }
 0x2b0   : > { %902 = vxpose.xlu1.b32.end [4/4] (short) (narrow) %v1294_v30, 32 }
 0x2b2   : > { %v1281_v36 = vpop.f32.mrb[8].mxu0  ;;  %v1301_v37 = vpop.f32.mrb[8].mxu1 }
 0x2b3   : > { %v676_v38 = vpop.f32.mrb[9].mxu0  ;;  %v756_v39 = vpop.f32.mrb[9].mxu1 }
 0x2b4   : > { %v1302_v40 = vpop.f32.mrb[10].mxu1  ;;  %803 = vxpose.xlu0.b32.start [1/4] (short) (narrow) %v676_v38, 32  ;;  %v1282_v41 = vpop.f32.mrb[10].mxu0 }
 0x2b5   : > { %v679_v42 = vpop.f32.mrb[11].mxu0  ;;  %v759_v43 = vpop.f32.mrb[11].mxu1 }
 0x2b8   : > { %804 = vxpose.xlu0.b32.cont [2/4] (short) (narrow) %v679_v42, 32 }
 0x2ba   : > { %v1285_v44 = vpop.f32.mrb[12].mxu0  ;;  %v1305_v45 = vpop.f32.mrb[12].mxu1 }
 0x2bb   : > { %v692_v46 = vpop.f32.mrb[13].mxu0  ;;  %v772_v47 = vpop.f32.mrb[13].mxu1 }
 0x2bc   : > { %805 = vxpose.xlu0.b32.cont [3/4] (short) (narrow) %v1281_v36, 32  ;;  %835 = vxpose.xlu1.b32.start [1/4] (short) (narrow) %v692_v46, 32  ;;  %v1286_v48 = vpop.f32.mrb[14].mxu0  ;;  %v1306_v49 = vpop.f32.mrb[14].mxu1 }
 0x2bd   : > { %v695_v50 = vpop.f32.mrb[15].mxu0  ;;  %v775_v51 = vpop.f32.mrb[15].mxu1 }
 0x2c0   : > { %806 = vxpose.xlu0.b32.end [4/4] (short) (narrow) %v1282_v41, 32  ;;  %836 = vxpose.xlu1.b32.cont [2/4] (short) (narrow) %v695_v50, 32 }
 0x2c2   : > { %v1289_v52 = vpop.f32.mrb[16].mxu0  ;;  %v1309_v53 = vpop.f32.mrb[16].mxu1 }
 0x2c3   : > { %v788_v54 = vpop.f32.mrb[17].mxu1  ;;  %v708_v55 = vpop.f32.mrb[17].mxu0 }
 0x2c4   : > { %931 = vxpose.xlu0.b32.start [1/4] (short) (narrow) %v740_v33, 32  ;;  %837 = vxpose.xlu1.b32.cont [3/4] (short) (narrow) %v1285_v44, 32  ;;  %v1290_v56 = vpop.f32.mrb[18].mxu0  ;;  %v1310_v57 = vpop.f32.mrb[18].mxu1 }
 0x2c5   : > { %v711_v58 = vpop.f32.mrb[19].mxu0  ;;  %v791_v59 = vpop.f32.mrb[19].mxu1 }
 0x2c8   : > { %932 = vxpose.xlu0.b32.cont [2/4] (short) (narrow) %v743_v35, 32  ;;  %838 = vxpose.xlu1.b32.end [4/4] (short) (narrow) %v1286_v48, 32 }
 0x2cc   : > { %933 = vxpose.xlu0.b32.cont [3/4] (short) (narrow) %v1297_v32, 32  ;;  %963 = vxpose.xlu1.b32.start [1/4] (short) (narrow) %v756_v39, 32 }
 0x2d0   : > { %934 = vxpose.xlu0.b32.end [4/4] (short) (narrow) %v1298_v34, 32  ;;  %964 = vxpose.xlu1.b32.cont [2/4] (short) (narrow) %v759_v43, 32 }
 0x2d4   : > { %965 = vxpose.xlu1.b32.cont [3/4] (short) (narrow) %v1301_v37, 32  ;;  %867 = vxpose.xlu0.b32.start [1/4] (short) (narrow) %v708_v55, 32 }
 0x2d8   : > { %966 = vxpose.xlu1.b32.end [4/4] (short) (narrow) %v1302_v40, 32  ;;  %868 = vxpose.xlu0.b32.cont [2/4] (short) (narrow) %v711_v58, 32 }
 0x2dc   : > { %1027 = vxpose.xlu1.b32.start [1/4] (short) (narrow) %v788_v54, 32  ;;  %869 = vxpose.xlu0.b32.cont [3/4] (short) (narrow) %v1289_v52, 32 }
 0x2e0   : > { %1028 = vxpose.xlu1.b32.cont [2/4] (short) (narrow) %v791_v59, 32  ;;  %870 = vxpose.xlu0.b32.end [4/4] (short) (narrow) %v1290_v56, 32 }
 0x2e4   : > { %1029 = vxpose.xlu1.b32.cont [3/4] (short) (narrow) %v1309_v53, 32  ;;  %995 = vxpose.xlu0.b32.start [1/4] (short) (narrow) %v772_v47, 32 }
 0x2e8   : > { %1030 = vxpose.xlu1.b32.end [4/4] (short) (narrow) %v1310_v57, 32  ;;  %996 = vxpose.xlu0.b32.cont [2/4] (short) (narrow) %v775_v51, 32 }
 0x2ec   : > { %997 = vxpose.xlu0.b32.cont [3/4] (short) (narrow) %v1305_v45, 32 }
 0x2f0   : > { %998 = vxpose.xlu0.b32.end [4/4] (short) (narrow) %v1306_v49, 32 }
 0x324   : > { %v915_v60 = vpop.trf.xlu1 }
 0x325   : > { %1072 = vst.msk [vmem:[%s1849_s23 + $0x60] sm:$0xff] %vm1059_vm2, %v915_v60 }
 0x328   : > { %v916_v61 = vpop.trf.xlu1 }
 0x329   : > { %1073 = vst.msk [vmem:[%s1849_s23 + $0x68] sm:$0xff] %vm1059_vm2, %v916_v61 }
 0x32c   : > { %v917_v62 = vpop.trf.xlu1 }
 0x32d   : > { %1074 = vst.msk [vmem:[%s1849_s23 + $0x70] sm:$0xff] %vm1059_vm2, %v917_v62 }
 0x330   : > { %v918_v63 = vpop.trf.xlu1 }
 0x331   : > { %1075 = vst.msk [vmem:[%s1849_s23 + $0x78] sm:$0xff] %vm1059_vm2, %v918_v63 }
 0x334   : > { %v819_v0 = vpop.trf.xlu0 }
 0x335   : > { %1060 = vst.msk [vmem:[%s1849_s23] sm:$0xff] %vm1059_vm2, %v819_v0 }
 0x338   : > { %v820_v1 = vpop.trf.xlu0 }
 0x339   : > { %1061 = vst.msk [vmem:[%s1849_s23 + $0x8] sm:$0xff] %vm1059_vm2, %v820_v1 }
 0x33c   : > { %v821_v2 = vpop.trf.xlu0  ;;  %v851_v3 = vpop.trf.xlu1 }
 0x33d   : > { %1062 = vst.msk [vmem:[%s1849_s23 + $0x10] sm:$0xff] %vm1059_vm2, %v821_v2  ;;  %1064 = vst.msk [vmem:[%s1849_s23 + $0x20] sm:$0xff] %vm1059_vm2, %v851_v3 }
 0x340   : > { %v822_v4 = vpop.trf.xlu0  ;;  %v852_v5 = vpop.trf.xlu1 }
 0x341   : > { %1063 = vst.msk [vmem:[%s1849_s23 + $0x18] sm:$0xff] %vm1059_vm2, %v822_v4  ;;  %1065 = vst.msk [vmem:[%s1849_s23 + $0x28] sm:$0xff] %vm1059_vm2, %v852_v5 }
 0x344   : > { %v947_v6 = vpop.trf.xlu0  ;;  %v853_v7 = vpop.trf.xlu1 }
 0x345   : > { %1076 = vst.msk [vmem:[%s1849_s23 + $0x80] sm:$0xff] %vm1059_vm2, %v947_v6  ;;  %1066 = vst.msk [vmem:[%s1849_s23 + $0x30] sm:$0xff] %vm1059_vm2, %v853_v7 }
 0x348   : > { %v948_v8 = vpop.trf.xlu0  ;;  %v854_v9 = vpop.trf.xlu1 }
 0x349   : > { %1077 = vst.msk [vmem:[%s1849_s23 + $0x88] sm:$0xff] %vm1059_vm2, %v948_v8  ;;  %1067 = vst.msk [vmem:[%s1849_s23 + $0x38] sm:$0xff] %vm1059_vm2, %v854_v9 }
 0x34c   : > { %v949_v10 = vpop.trf.xlu0  ;;  %v979_v11 = vpop.trf.xlu1 }
 0x34d   : > { %1078 = vst.msk [vmem:[%s1849_s23 + $0x90] sm:$0xff] %vm1059_vm2, %v949_v10  ;;  %1080 = vst.msk [vmem:[%s1849_s23 + $0xa0] sm:$0xff] %vm1059_vm2, %v979_v11 }
 0x350   : > { %v950_v12 = vpop.trf.xlu0  ;;  %v980_v13 = vpop.trf.xlu1 }
 0x351   : > { %1079 = vst.msk [vmem:[%s1849_s23 + $0x98] sm:$0xff] %vm1059_vm2, %v950_v12  ;;  %1081 = vst.msk [vmem:[%s1849_s23 + $0xa8] sm:$0xff] %vm1059_vm2, %v980_v13 }
 0x354   : > { %v883_v14 = vpop.trf.xlu0  ;;  %v981_v15 = vpop.trf.xlu1 }
 0x355   : > { %1068 = vst.msk [vmem:[%s1849_s23 + $0x40] sm:$0xff] %vm1059_vm2, %v883_v14  ;;  %1082 = vst.msk [vmem:[%s1849_s23 + $0xb0] sm:$0xff] %vm1059_vm2, %v981_v15 }
 0x358   : > { %v884_v16 = vpop.trf.xlu0  ;;  %v982_v17 = vpop.trf.xlu1 }
 0x359   : > { %1069 = vst.msk [vmem:[%s1849_s23 + $0x48] sm:$0xff] %vm1059_vm2, %v884_v16  ;;  %1083 = vst.msk [vmem:[%s1849_s23 + $0xb8] sm:$0xff] %vm1059_vm2, %v982_v17 }
 0x35c   : > { %v885_v18 = vpop.trf.xlu0  ;;  %v1043_v19 = vpop.trf.xlu1 }
 0x35d   : > { %1070 = vst.msk [vmem:[%s1849_s23 + $0x50] sm:$0xff] %vm1059_vm2, %v885_v18  ;;  %1088 = vst.msk [vmem:[%s1849_s23 + $0xe0] sm:$0xff] %vm1059_vm2, %v1043_v19 }
 0x360   : > { %v886_v20 = vpop.trf.xlu0  ;;  %v1044_v21 = vpop.trf.xlu1 }
 0x361   : > { %1071 = vst.msk [vmem:[%s1849_s23 + $0x58] sm:$0xff] %vm1059_vm2, %v886_v20  ;;  %1089 = vst.msk [vmem:[%s1849_s23 + $0xe8] sm:$0xff] %vm1059_vm2, %v1044_v21 }
 0x364   : > { %v1011_v22 = vpop.trf.xlu0  ;;  %v1045_v23 = vpop.trf.xlu1 }
 0x365   : > { %1084 = vst.msk [vmem:[%s1849_s23 + $0xc0] sm:$0xff] %vm1059_vm2, %v1011_v22  ;;  %1090 = vst.msk [vmem:[%s1849_s23 + $0xf0] sm:$0xff] %vm1059_vm2, %v1045_v23 }
 0x368   : > { %v1012_v24 = vpop.trf.xlu0  ;;  %v1046_v25 = vpop.trf.xlu1 }
 0x369   : > { %1085 = vst.msk [vmem:[%s1849_s23 + $0xc8] sm:$0xff] %vm1059_vm2, %v1012_v24  ;;  %1091 = vst.msk [vmem:[%s1849_s23 + $0xf8] sm:$0xff] %vm1059_vm2, %v1046_v25 }
 0x36c   : > { %v1013_v26 = vpop.trf.xlu0 }
 0x36d   : > { %1086 = vst.msk [vmem:[%s1849_s23 + $0xd0] sm:$0xff] %vm1059_vm2, %v1013_v26 }
 0x370   : > { %v1014_v27 = vpop.trf.xlu0 }
 0x371   : > { %1087 = vst.msk [vmem:[%s1849_s23 + $0xd8] sm:$0xff] %vm1059_vm2, %v1014_v27 }
 0x372   : > { %1553 = shalt.err (!%p1550_p7)
}
 0x373   : > { %s1554_s8 = scalar_lea.hbm %s1918_s6, 4096  ;;  %s1558_s26 = scalar_lea.hbm %s1973_s3, 32768 }
 0x374   : > { %p1555_p1 = scmp.ne.s32.totalorder %s1918_s6, %s1554_s8  ;;  %p1559_p12 = scmp.lt.u32.totalorder %s1918_s6, %s1973_s3 }
 0x375   : > { %p1560_p2 = scmp.lt.u32.totalorder %s1558_s26, %s1554_s8  ;;  %p1562_p8 = scmp.lt.u32.totalorder %s1554_s8, %s1918_s6 }
 0x376   : > { %p1556_p4 = pnand %p1555_p1, %p1994_p10 }
 0x377   : > { %p1561_p6 = por %p1560_p2, %p1559_p12 }
 0x378   : > { %p1557_p5 = pneg %p1556_p4 }
 0x379   : > { %p1563_p11 = por %p1562_p8, %p1561_p6 }
 0x37b   : > { %p1564_p13 = pnand %p1563_p11, %p1557_p5 }
 0x37d   : > { %1567 = shalt.err (!%p1564_p13)
}
 0x37e   : > { %s1633_s23 = smov 128   ;;  %s1634_s18 = smov 8  }
 0x37f   : > { %1322 = dma.vmem_to_hbm [thread:$0]  (%p1994_p10), %s1920_s22, 4096, %s1918_s6, %s1093_s11, %s1633_s23, %s1633_s23, %s1634_s18  }
 0x380 PF: > { %p1339_p0 = scmp.ge.s32.totalorder %s1626_s17, 2  ;;  %s1124_s5 = sand.u32 1, %s1606_s12  }
 0x381   : > { %p1995_p9 = scmp.ne.s32.totalorder %s1984_s25, 0  ;;  %s1125_s20 = scalar_lea.sflag [#allocation4], %s1124_s5 }
 0x383   : > { %p1333_p3 = pnand %p1339_p0, %p1995_p9 }
 0x385   : > { %1601 = dma.done.wait (!%p1333_p3), %s1125_s20, 4096  }
 0x386   : > { %1603 = vsyncadd (!%p1333_p3), %s1125_s20, 4294963200  ;;  %s20_s17 = sadd.s32 1, %s1626_s17   ;;  %s1996_s12 = smov %s1610_s13 }
 0x387   : > { %p17_p7 = scmp.ge.s32.totalorder %s20_s17, 10   ;;  %s1997_s13 = smov %s1614_s14 }
 0x388   : > { %s1998_s14 = smov %s1773_s28  ;;  %s1999_s15 = smov %s1622_s16 }
 0x389   : > { %s2000_s16 = smov %s2002_s4  ;;  %19 = sbr.rel (!%p17_p7) target bundleno = 7 (0x7), region = 81 }
 0x390   :  { %1130 = vsyncpa [#allocation3], 1 }
 0x391   :  { %1132 = vsyncpa [#allocation3 + $0x1], 1 }
 0x392   :  { %1133 = vsyncpa [#allocation6], 1 }
 0x393   :  { %1134 = vsyncpa [#allocation4], 1 }
 0x394   :  { %1136 = vsyncpa [#allocation4 + $0x1], 1 }

</bundles_post_ra>
